<compile_context>
chip_gen: v7x
topology: tpu7x:2x2x1
jax: 0.10.0
libtpu: 0.0.40
codegen_flags: <defaults>
</compile_context>

<pallas_src>
import functools

import jax
import jax.numpy as jnp
from jax.experimental import pallas as pl
from jax.experimental.pallas import tpu as pltpu

NEG_SLOPE = 0.01    # F.leaky_relu default negative slope
BN_EPS = 1e-5       # BatchNorm1d default eps
LANE = 128          # TPU lane width


def _round_up(v, m):
    return ((v + m - 1) // m) * m


def _detect_vmem_limit(fraction=0.75, fallback=48 * 1024 * 1024):
    """Generation-aware scoped-VMEM limit (v7x 64 MiB/TC vs v5e/v6e 128 MiB)."""
    try:
        cap = pltpu.get_tpu_info().vmem_capacity_bytes
        return int(max(32 * 1024 * 1024, min(cap * fraction, 112 * 1024 * 1024)))
    except Exception:
        return fallback


VMEM_LIMIT = _detect_vmem_limit()


def _vmem():
    return pl.BlockSpec(memory_space=pltpu.MemorySpace.VMEM)


# --------------- kernel 1: BN + constant-folded (lin_w @ conv1_w) projection --

def bn_fold_kernel(x_ref, gamma_ref, beta_ref, wf_ref, bf_ref, o_ref):
    """xw1 = BN(x) @ (lin_w @ conv1_w) + lin_b @ conv1_w, shared by branches."""
    x = x_ref[...]                                             # [N, C]
    mean = jnp.mean(x, axis=0, keepdims=True)
    var = jnp.mean((x - mean) ** 2, axis=0, keepdims=True)     # biased var (BN train)
    # TODO(synk): if this kernel is ever tiled over N, batch stats must become
    # a cross-tile (sum, sumsq) accumulator instead of per-block mean/var.
    xn = (x - mean) * jax.lax.rsqrt(var + BN_EPS)
    xn = xn * gamma_ref[...] + beta_ref[...]
    o_ref[...] = (jnp.dot(xn, wf_ref[...], preferred_element_type=jnp.float32)
                  + bf_ref[...])


def bn_fold_linear(x, gamma, beta, w_fold, b_fold):
    n, c = x.shape
    hp = w_fold.shape[1]
    return pl.pallas_call(
        bn_fold_kernel,
        out_shape=jax.ShapeDtypeStruct((n, hp), jnp.float32),
        in_specs=[_vmem()] * 5,
        out_specs=_vmem(),
        compiler_params=pltpu.CompilerParams(vmem_limit_bytes=VMEM_LIMIT),
    )(x, gamma.reshape(1, c), beta.reshape(1, c), w_fold, b_fold.reshape(1, -1))


# -------- kernel 2: both GCN layers of one branch, grid parallel over branch --

def branch_gcn_kernel(a_ref, xw1_ref, b1_ref, w2_ref, b2_ref, o_ref):
    a = a_ref[0]                                               # [N, N] bf16
    xw1 = xw1_ref[...].astype(jnp.bfloat16)
    # conv1: A @ (x @ W1) + b1   (bf16 MXU operands, f32 accumulate)
    y = jnp.dot(a, xw1, preferred_element_type=jnp.float32) + b1_ref[...]
    y = jnp.where(y > 0, y, NEG_SLOPE * y)                     # leaky_relu, f32 VALU
    # TODO(synk): dropout treated as identity (p = 0 / eval mode).
    yw = jnp.dot(y.astype(jnp.bfloat16), w2_ref[...],
                 preferred_element_type=jnp.float32)
    y2 = jnp.dot(a, yw.astype(jnp.bfloat16),
                 preferred_element_type=jnp.float32) + b2_ref[...]
    o_ref[0] = jnp.where(y2 > 0, y2, NEG_SLOPE * y2)           # leaky_relu(conv2)


def branch_gcn(a_stack, xw1, conv1_b, conv2_w_bf16, conv2_b):
    nb, n, _ = a_stack.shape
    hp = xw1.shape[1]
    return pl.pallas_call(
        branch_gcn_kernel,
        out_shape=jax.ShapeDtypeStruct((nb, n, hp), jnp.float32),
        grid=(nb,),
        in_specs=[
            pl.BlockSpec((1, n, n), lambda b: (b, 0, 0)),      # branch's A_hat (bf16)
            pl.BlockSpec((n, hp), lambda b: (0, 0)),           # shared xw1
            pl.BlockSpec((1, hp), lambda b: (0, 0)),
            pl.BlockSpec((hp, hp), lambda b: (0, 0)),          # conv2_w (bf16)
            pl.BlockSpec((1, hp), lambda b: (0, 0)),
        ],
        out_specs=pl.BlockSpec((1, n, hp), lambda b: (b, 0, 0)),
        compiler_params=pltpu.CompilerParams(
            # supply / demand branches are independent -> v7x megacore split
            dimension_semantics=("parallel",),
            vmem_limit_bytes=VMEM_LIMIT,
        ),
    )(a_stack, xw1, conv1_b.reshape(1, -1), conv2_w_bf16, conv2_b.reshape(1, -1))


# ---- kernel 3: in-kernel one-hot gather (MXU) + cosine + lamda_17 smoothing --

def edge_score_kernel(src_ref, dst_ref, sr_ref, lam16_ref, lam15_ref, o_ref, *, alpha):
    n = sr_ref.shape[1]
    te = src_ref.shape[1]
    # Build the [N, TE] one-hot gather matrices in-register from the (1, TE)
    # int32 index rows (iota-compare is exact in bf16); nothing O(N*E) ever
    # touches HBM.
    iota_n = jax.lax.broadcasted_iota(jnp.int32, (n, te), 0)
    oh_s = (iota_n == src_ref[...]).astype(jnp.bfloat16)       # [N, TE]
    oh_d = (iota_n == dst_ref[...]).astype(jnp.bfloat16)
    s = sr_ref[0].astype(jnp.bfloat16)                         # [N, Hp]
    r = sr_ref[1].astype(jnp.bfloat16)
    # Gather s[src] / r[dst] on the MXU: contract over N without an explicit
    # XLU transpose; result stays [Hp, TE] so the (1, TE) output is lane-dense.
    dn = (((0,), (0,)), ((), ()))
    s1 = jax.lax.dot_general(s, oh_s, dn, preferred_element_type=jnp.float32)
    r1 = jax.lax.dot_general(r, oh_d, dn, preferred_element_type=jnp.float32)
    dot = jnp.sum(s1 * r1, axis=0, keepdims=True)              # (1, TE)
    ns2 = jnp.sum(s1 * s1, axis=0, keepdims=True)
    nr2 = jnp.sum(r1 * r1, axis=0, keepdims=True)
    # rsqrt keeps the normalization on the EUP; no epsilon to match the module.
    logits = dot * jax.lax.rsqrt(ns2 * nr2)
    # get_lamda_17: 2*l1 - l2 + a/(1-a)*(l1-l2) with l2 = a*l1 + (1-a)*logits
    # collapses exactly to 2*l1 - logits.
    l1 = alpha * lam16_ref[...] + (1.0 - alpha) * lam15_ref[...]
    o_ref[...] = 2.0 * l1 - logits


def edge_score(src_row, dst_row, sr, lam16_row, lam15_row, *, alpha, tile_e=LANE):
    nb, n, hp = sr.shape
    ep = src_row.shape[1]
    return pl.pallas_call(
        functools.partial(edge_score_kernel, alpha=alpha),
        out_shape=jax.ShapeDtypeStruct((1, ep), jnp.float32),  # lane-dense output
        grid=(ep // tile_e,),
        in_specs=[
            pl.BlockSpec((1, tile_e), lambda e: (0, e)),       # src indices
            pl.BlockSpec((1, tile_e), lambda e: (0, e)),       # dst indices
            pl.BlockSpec((nb, n, hp), lambda e: (0, 0, 0)),    # s / r embeddings
            pl.BlockSpec((1, tile_e), lambda e: (0, e)),
            pl.BlockSpec((1, tile_e), lambda e: (0, e)),
        ],
        out_specs=pl.BlockSpec((1, tile_e), lambda e: (0, e)),
        compiler_params=pltpu.CompilerParams(
            dimension_semantics=("parallel",),                 # edge chunks independent
            vmem_limit_bytes=VMEM_LIMIT,
        ),
    )(src_row, dst_row, sr, lam16_row, lam15_row)


# ------------------------------------------------------------------- glue ----

def gcn_norm_dense(src, dst, n):
    """Dense D^-1/2 (A + I) D^-1/2, messages src -> dst (PyG gcn_norm)."""
    loop = jnp.arange(n, dtype=src.dtype)
    s = jnp.concatenate([src, loop])
    d = jnp.concatenate([dst, loop])
    deg = jnp.zeros((n,), jnp.float32).at[d].add(1.0)
    dinv = jnp.where(deg > 0, jax.lax.rsqrt(deg), 0.0)
    w = dinv[s] * dinv[d]
    return jnp.zeros((n, n), jnp.float32).at[d, s].add(w)


def _prep_params(params, h, hp):
    """Constant-fold lin->conv1 weights and zero-pad hidden to 128 lanes."""
    ph = hp - h
    w_fold = params["lin_w"] @ params["conv1_w"]               # [C, H]
    b_fold = params["lin_b"] @ params["conv1_w"]               # [H]
    return {
        "w_fold": jnp.pad(w_fold, ((0, 0), (0, ph))),
        "b_fold": jnp.pad(b_fold, (0, ph)),
        "conv1_b": jnp.pad(params["conv1_b"], (0, ph)),
        # conv2_w is an MXU operand only -> ship it as bf16 (halves its DMA).
        "conv2_w": jnp.pad(params["conv2_w"], ((0, ph), (0, ph))).astype(jnp.bfloat16),
        "conv2_b": jnp.pad(params["conv2_b"], (0, ph)),
    }


def gdes_forward(params, x, edge_index, lambda_16_hat, *, alpha):
    src = edge_index[:, 0].astype(jnp.int32)
    dst = edge_index[:, 1].astype(jnp.int32)
    n = x.shape[0]
    e = src.shape[0]
    h = params["conv1_w"].shape[0]
    hp = _round_up(h, LANE)
    ep = _round_up(e, LANE)
    pp = _prep_params(params, h, hp)

    # Dense normalized adjacencies; "demand" graph = reversed edge direction.
    # bf16 halves the A HBM->VMEM traffic and VMEM residency (values <= 1).
    a_supply = gcn_norm_dense(src, dst, n)
    a_demand = gcn_norm_dense(dst, src, n)
    a_stack = jnp.stack([a_supply, a_demand], axis=0).astype(jnp.bfloat16)  # [2,N,N]

    # x = self.linear(self.bns(x)); lin_w@conv1_w folded -> one small dot.
    xw1 = bn_fold_linear(x, params["bn_gamma"], params["bn_beta"],
                         pp["w_fold"], pp["b_fold"])

    # Both GCN layers of both branches, branch axis parallel.
    sr = branch_gcn(a_stack, xw1, pp["conv1_b"], pp["conv2_w"], pp["conv2_b"])

    # Edge arrays padded to a 128-lane multiple (unmasked vst); padded edges
    # point at node 0 and are sliced off after the call.
    src_p = jnp.pad(src, (0, ep - e)).reshape(1, ep)
    dst_p = jnp.pad(dst, (0, ep - e)).reshape(1, ep)
    lam16_p = jnp.pad(lambda_16_hat.reshape(1, e), ((0, 0), (0, ep - e)))
    lam15_p = jnp.pad(params["lamda_15_1"].reshape(1, e), ((0, 0), (0, ep - e)))

    # TODO(synk): use_location branch skipped (location vectors come from .npy).
    lam17 = edge_score(src_p, dst_p, sr, lam16_p, lam15_p, alpha=alpha)
    return lam17[0, :e]                                        # .squeeze() -> [E]


# ----------------------------------------------------------- pure-JAX ref ----

def reference(params, x, edge_index, lam16, alpha):
    src = edge_index[:, 0]
    dst = edge_index[:, 1]
    n = x.shape[0]
    mean = x.mean(0)
    var = ((x - mean) ** 2).mean(0)
    xn = (x - mean) / jnp.sqrt(var + BN_EPS) * params["bn_gamma"] + params["bn_beta"]
    h = xn @ params["lin_w"] + params["lin_b"]
    a_s = gcn_norm_dense(src, dst, n)
    a_d = gcn_norm_dense(dst, src, n)
    lrelu = lambda v: jnp.where(v > 0, v, NEG_SLOPE * v)
    s = lrelu(a_s @ (h @ params["conv1_w"]) + params["conv1_b"])
    s = lrelu(a_s @ (s @ params["conv2_w"]) + params["conv2_b"])
    r = lrelu(a_d @ (h @ params["conv1_w"]) + params["conv1_b"])
    r = lrelu(a_d @ (r @ params["conv2_w"]) + params["conv2_b"])
    s1 = s[src]
    r1 = r[dst]
    logits = (s1 * r1).sum(1) / (jnp.linalg.norm(s1, axis=1) * jnp.linalg.norm(r1, axis=1))
    l1 = alpha * lam16 + (1 - alpha) * params["lamda_15_1"]
    l2 = alpha * l1 + (1 - alpha) * logits[:, None]
    return (2 * l1 - l2 + alpha / (1 - alpha) * (l1 - l2))[:, 0]


# ------------------------------------------------------------------ main -----

if __name__ == "__main__":
    N, C, H, E = 16, 8, 32, 16          # nodes, in_channels, hidden_channels, edges
    ALPHA = 0.9

    key = jax.random.PRNGKey(0)
    keys = jax.random.split(key, 12)

    params = {
        "bn_gamma": jnp.ones((C,), jnp.float32),
        "bn_beta": jnp.zeros((C,), jnp.float32),
        "lin_w": 0.3 * jax.random.normal(keys[0], (C, H), jnp.float32),
        "lin_b": 0.1 * jax.random.normal(keys[1], (H,), jnp.float32),
        "conv1_w": 0.3 * jax.random.normal(keys[2], (H, H), jnp.float32),
        "conv1_b": 0.1 * jax.random.normal(keys[3], (H,), jnp.float32),
        "conv2_w": 0.3 * jax.random.normal(keys[4], (H, H), jnp.float32),
        "conv2_b": 0.1 * jax.random.normal(keys[5], (H,), jnp.float32),
        "lamda_15_1": jax.random.normal(keys[6], (E, 1), jnp.float32),
    }

    x = jax.random.normal(keys[7], (N, C), jnp.float32)
    src = jax.random.randint(keys[8], (E,), 0, N, jnp.int32)
    dst = jax.random.randint(keys[9], (E,), 0, N, jnp.int32)
    edge_index = jnp.stack([src, dst], axis=1)                  # [E, 2]
    lambda_16_hat = jax.random.normal(keys[10], (E, 1), jnp.float32)

    fwd = jax.jit(functools.partial(gdes_forward, alpha=ALPHA))
    out = fwd(params, x, edge_index, lambda_16_hat)
    out = jax.block_until_ready(out)

    ref = reference(params, x, edge_index, lambda_16_hat, ALPHA)
    assert out.shape == (E,)
    assert jnp.allclose(out, ref, atol=2e-2, rtol=2e-2), (
        f"max abs err = {jnp.max(jnp.abs(out - ref))}")

    print("KERNEL_OK")
</pallas_src>

<mosaic_0001>
module attributes {stable_mosaic.version = 11 : i64} {
  func.func private @main(%arg0: i32) attributes {dimension_semantics = [#tpu.dimension_semantics<core_parallel>], iteration_bounds = array<i64: 2>, tpu.core_type = #tpu.core_type<sc_scalar_subcore>, window_params = []} {
    return
  }
}

module attributes {stable_mosaic.version = 11 : i64} {
  func.func private @main(%arg0: i32) attributes {dimension_semantics = [#tpu.dimension_semantics<core_parallel>], iteration_bounds = array<i64: 2>, tpu.core_type = #tpu.core_type<sc_scalar_subcore>, window_params = []} {
    return
  }
}

module attributes {stable_mosaic.version = 11 : i64} {
  func.func @bn_fold_kernel(%arg0: memref<16x8xf32, #tpu.memory_space<vmem>>, %arg1: memref<1x8xf32, #tpu.memory_space<vmem>>, %arg2: memref<1x8xf32, #tpu.memory_space<vmem>>, %arg3: memref<8x128xf32, #tpu.memory_space<vmem>>, %arg4: memref<1x128xf32, #tpu.memory_space<vmem>>, %arg5: memref<16x128xf32, #tpu.memory_space<vmem>>) attributes {dimension_semantics = [], scalar_prefetch = 0 : i64, scratch_operands = 0 : i64, tpu.core_type = #tpu.core_type<tc>} {
    %c0 = arith.constant 0 : index
    %c0_0 = arith.constant 0 : index
    %0 = vector.load %arg0[%c0, %c0_0] : memref<16x8xf32, #tpu.memory_space<vmem>>, vector<16x8xf32>
    %cst = arith.constant dense<0.000000e+00> : vector<8xf32>
    %1 = vector.multi_reduction <add>, %0, %cst [0] : vector<16x8xf32> to vector<8xf32>
    %2 = vector.shape_cast %1 : vector<8xf32> to vector<1x8xf32>
    %cst_1 = arith.constant 1.600000e+01 : f32
    %3 = vector.broadcast %cst_1 : f32 to vector<1x8xf32>
    %4 = arith.divf %2, %3 : vector<1x8xf32>
    %5 = vector.broadcast %4 : vector<1x8xf32> to vector<16x8xf32>
    %6 = arith.subf %0, %5 : vector<16x8xf32>
    %7 = arith.mulf %6, %6 : vector<16x8xf32>
    %cst_2 = arith.constant dense<0.000000e+00> : vector<8xf32>
    %8 = vector.multi_reduction <add>, %7, %cst_2 [0] : vector<16x8xf32> to vector<8xf32>
    %9 = vector.shape_cast %8 : vector<8xf32> to vector<1x8xf32>
    %cst_3 = arith.constant 1.600000e+01 : f32
    %10 = vector.broadcast %cst_3 : f32 to vector<1x8xf32>
    %11 = arith.divf %9, %10 : vector<1x8xf32>
    %12 = vector.broadcast %4 : vector<1x8xf32> to vector<16x8xf32>
    %13 = arith.subf %0, %12 : vector<16x8xf32>
    %cst_4 = arith.constant 9.99999974E-6 : f32
    %14 = vector.broadcast %cst_4 : f32 to vector<1x8xf32>
    %15 = arith.addf %11, %14 : vector<1x8xf32>
    %16 = math.rsqrt %15 : vector<1x8xf32>
    %17 = vector.broadcast %16 : vector<1x8xf32> to vector<16x8xf32>
    %18 = arith.mulf %13, %17 : vector<16x8xf32>
    %c0_5 = arith.constant 0 : index
    %c0_6 = arith.constant 0 : index
    %19 = vector.load %arg1[%c0_5, %c0_6] : memref<1x8xf32, #tpu.memory_space<vmem>>, vector<1x8xf32>
    %20 = vector.broadcast %19 : vector<1x8xf32> to vector<16x8xf32>
    %21 = arith.mulf %18, %20 : vector<16x8xf32>
    %c0_7 = arith.constant 0 : index
    %c0_8 = arith.constant 0 : index
    %22 = vector.load %arg2[%c0_7, %c0_8] : memref<1x8xf32, #tpu.memory_space<vmem>>, vector<1x8xf32>
    %23 = vector.broadcast %22 : vector<1x8xf32> to vector<16x8xf32>
    %24 = arith.addf %21, %23 : vector<16x8xf32>
    %c0_9 = arith.constant 0 : index
    %c0_10 = arith.constant 0 : index
    %25 = vector.load %arg3[%c0_9, %c0_10] : memref<8x128xf32, #tpu.memory_space<vmem>>, vector<8x128xf32>
    %cst_11 = arith.constant dense<0.000000e+00> : vector<16x128xf32>
    %26 = tpu.matmul %24, %25, %cst_11 {dimension_numbers = #tpu.dot_dimension_numbers<[1], [0], [0], [1], [0, 0, 1, 1], [], []>} : vector<16x8xf32>, vector<8x128xf32>, vector<16x128xf32> -> vector<16x128xf32>
    %c0_12 = arith.constant 0 : index
    %c0_13 = arith.constant 0 : index
    %27 = vector.load %arg4[%c0_12, %c0_13] : memref<1x128xf32, #tpu.memory_space<vmem>>, vector<1x128xf32>
    %28 = vector.broadcast %27 : vector<1x128xf32> to vector<16x128xf32>
    %29 = arith.addf %26, %28 : vector<16x128xf32>
    %c0_14 = arith.constant 0 : index
    %c0_15 = arith.constant 0 : index
    %30 = vector.load %arg5[%c0_14, %c0_15] : memref<16x128xf32, #tpu.memory_space<vmem>>, vector<16x128xf32>
    tpu.vector_store %arg5[%c0_14, %c0_15], %29 {strides = array<i32>} : memref<16x128xf32, #tpu.memory_space<vmem>>, vector<16x128xf32>,
    return
  }
}

module attributes {stable_mosaic.version = 11 : i64} {
  func.func @branch_gcn_kernel(%arg0: i32, %arg1: memref<1x16x16xbf16, #tpu.memory_space<vmem>>, %arg2: memref<16x128xf32, #tpu.memory_space<vmem>>, %arg3: memref<1x128xf32, #tpu.memory_space<vmem>>, %arg4: memref<128x128xbf16, #tpu.memory_space<vmem>>, %arg5: memref<1x128xf32, #tpu.memory_space<vmem>>, %arg6: memref<1x16x128xf32, #tpu.memory_space<vmem>>) attributes {dimension_semantics = [#tpu.dimension_semantics<parallel>], iteration_bounds = array<i64: 2>, scalar_prefetch = 0 : i64, scratch_operands = 0 : i64, tpu.core_type = #tpu.core_type<tc>, window_params = [{transform_indices = @transform_0, window_bounds = array<i64: 1, 16, 16>}, {pipeline_mode = #tpu.pipeline_mode<synchronous>, transform_indices = @transform_1, window_bounds = array<i64: 16, 128>}, {pipeline_mode = #tpu.pipeline_mode<synchronous>, transform_indices = @transform_2, window_bounds = array<i64: 1, 128>}, {pipeline_mode = #tpu.pipeline_mode<synchronous>, transform_indices = @transform_3, window_bounds = array<i64: 128, 128>}, {pipeline_mode = #tpu.pipeline_mode<synchronous>, transform_indices = @transform_4, window_bounds = array<i64: 1, 128>}, {transform_indices = @transform_5, window_bounds = array<i64: 1, 16, 128>}]} {
    %c0 = arith.constant 0 : index
    %c0_0 = arith.constant 0 : index
    %c0_1 = arith.constant 0 : index
    %0 = vector.load %arg1[%c0, %c0_0, %c0_1] : memref<1x16x16xbf16, #tpu.memory_space<vmem>>, vector<1x16x16xbf16>
    %1 = vector.shape_cast %0 : vector<1x16x16xbf16> to vector<16x16xbf16>
    %c0_2 = arith.constant 0 : index
    %c0_3 = arith.constant 0 : index
    %2 = vector.load %arg2[%c0_2, %c0_3] : memref<16x128xf32, #tpu.memory_space<vmem>>, vector<16x128xf32>
    %3 = arith.truncf %2 : vector<16x128xf32> to vector<16x128xbf16>
    %cst = arith.constant dense<0.000000e+00> : vector<16x128xf32>
    %4 = tpu.matmul %1, %3, %cst {dimension_numbers = #tpu.dot_dimension_numbers<[1], [0], [0], [1], [0, 0, 1, 1], [], []>} : vector<16x16xbf16>, vector<16x128xbf16>, vector<16x128xf32> -> vector<16x128xf32>
    %c0_4 = arith.constant 0 : index
    %c0_5 = arith.constant 0 : index
    %5 = vector.load %arg3[%c0_4, %c0_5] : memref<1x128xf32, #tpu.memory_space<vmem>>, vector<1x128xf32>
    %6 = vector.broadcast %5 : vector<1x128xf32> to vector<16x128xf32>
    %7 = arith.addf %4, %6 : vector<16x128xf32>
    %cst_6 = arith.constant 0.000000e+00 : f32
    %8 = vector.broadcast %cst_6 : f32 to vector<16x128xf32>
    %9 = arith.cmpf ogt, %7, %8 : vector<16x128xf32>
    %cst_7 = arith.constant 0.00999999977 : f32
    %10 = vector.broadcast %cst_7 : f32 to vector<16x128xf32>
    %11 = arith.mulf %10, %7 : vector<16x128xf32>
    %12 = arith.select %9, %7, %11 : vector<16x128xi1>, vector<16x128xf32>
    %13 = arith.truncf %12 : vector<16x128xf32> to vector<16x128xbf16>
    %c0_8 = arith.constant 0 : index
    %c0_9 = arith.constant 0 : index
    %14 = vector.load %arg4[%c0_8, %c0_9] : memref<128x128xbf16, #tpu.memory_space<vmem>>, vector<128x128xbf16>
    %cst_10 = arith.constant dense<0.000000e+00> : vector<16x128xf32>
    %15 = tpu.matmul %13, %14, %cst_10 {dimension_numbers = #tpu.dot_dimension_numbers<[1], [0], [0], [1], [0, 0, 1, 1], [], []>} : vector<16x128xbf16>, vector<128x128xbf16>, vector<16x128xf32> -> vector<16x128xf32>
    %16 = arith.truncf %15 : vector<16x128xf32> to vector<16x128xbf16>
    %cst_11 = arith.constant dense<0.000000e+00> : vector<16x128xf32>
    %17 = tpu.matmul %1, %16, %cst_11 {dimension_numbers = #tpu.dot_dimension_numbers<[1], [0], [0], [1], [0, 0, 1, 1], [], []>} : vector<16x16xbf16>, vector<16x128xbf16>, vector<16x128xf32> -> vector<16x128xf32>
    %c0_12 = arith.constant 0 : index
    %c0_13 = arith.constant 0 : index
    %18 = vector.load %arg5[%c0_12, %c0_13] : memref<1x128xf32, #tpu.memory_space<vmem>>, vector<1x128xf32>
    %19 = vector.broadcast %18 : vector<1x128xf32> to vector<16x128xf32>
    %20 = arith.addf %17, %19 : vector<16x128xf32>
    %cst_14 = arith.constant 0.000000e+00 : f32
    %21 = vector.broadcast %cst_14 : f32 to vector<16x128xf32>
    %22 = arith.cmpf ogt, %20, %21 : vector<16x128xf32>
    %cst_15 = arith.constant 0.00999999977 : f32
    %23 = vector.broadcast %cst_15 : f32 to vector<16x128xf32>
    %24 = arith.mulf %23, %20 : vector<16x128xf32>
    %25 = arith.select %22, %20, %24 : vector<16x128xi1>, vector<16x128xf32>
    %c0_16 = arith.constant 0 : index
    %c0_17 = arith.constant 0 : index
    %c0_18 = arith.constant 0 : index
    %26 = vector.load %arg6[%c0_16, %c0_17, %c0_18] : memref<1x16x128xf32, #tpu.memory_space<vmem>>, vector<1x16x128xf32>
    %27 = vector.shape_cast %26 : vector<1x16x128xf32> to vector<16x128xf32>
    %28 = vector.shape_cast %25 : vector<16x128xf32> to vector<1x16x128xf32>
    tpu.vector_store %arg6[%c0_16, %c0_17, %c0_18], %28 {strides = array<i32>} : memref<1x16x128xf32, #tpu.memory_space<vmem>>, vector<1x16x128xf32>,
    return
  }
  func.func @transform_0(%arg0: i32) -> (i32, i32, i32) {
    %c0_i32 = arith.constant 0 : i32
    %c0_i32_0 = arith.constant 0 : i32
    %c0_i32_1 = arith.constant 0 : i32
    return %arg0, %c0_i32, %c0_i32_0 : i32, i32, i32
  }
  func.func @transform_1(%arg0: i32) -> (i32, i32) {
    %c0_i32 = arith.constant 0 : i32
    %c0_i32_0 = arith.constant 0 : i32
    %c0_i32_1 = arith.constant 0 : i32
    return %c0_i32, %c0_i32_0 : i32, i32
  }
  func.func @transform_2(%arg0: i32) -> (i32, i32) {
    %c0_i32 = arith.constant 0 : i32
    %c0_i32_0 = arith.constant 0 : i32
    %c0_i32_1 = arith.constant 0 : i32
    return %c0_i32, %c0_i32_0 : i32, i32
  }
  func.func @transform_3(%arg0: i32) -> (i32, i32) {
    %c0_i32 = arith.constant 0 : i32
    %c0_i32_0 = arith.constant 0 : i32
    %c0_i32_1 = arith.constant 0 : i32
    return %c0_i32, %c0_i32_0 : i32, i32
  }
  func.func @transform_4(%arg0: i32) -> (i32, i32) {
    %c0_i32 = arith.constant 0 : i32
    %c0_i32_0 = arith.constant 0 : i32
    %c0_i32_1 = arith.constant 0 : i32
    return %c0_i32, %c0_i32_0 : i32, i32
  }
  func.func @transform_5(%arg0: i32) -> (i32, i32, i32) {
    %c0_i32 = arith.constant 0 : i32
    %c0_i32_0 = arith.constant 0 : i32
    %c0_i32_1 = arith.constant 0 : i32
    return %arg0, %c0_i32, %c0_i32_0 : i32, i32, i32
  }
}

module attributes {stable_mosaic.version = 11 : i64} {
  func.func @edge_score_kernel(%arg0: i32, %arg1: memref<1x128xi32, #tpu.memory_space<vmem>>, %arg2: memref<1x128xi32, #tpu.memory_space<vmem>>, %arg3: memref<2x16x128xf32, #tpu.memory_space<vmem>>, %arg4: memref<1x128xf32, #tpu.memory_space<vmem>>, %arg5: memref<1x128xf32, #tpu.memory_space<vmem>>, %arg6: memref<1x128xf32, #tpu.memory_space<vmem>>) attributes {dimension_semantics = [#tpu.dimension_semantics<parallel>], iteration_bounds = array<i64: 1>, scalar_prefetch = 0 : i64, scratch_operands = 0 : i64, tpu.core_type = #tpu.core_type<tc>, window_params = [{transform_indices = @transform_0, window_bounds = array<i64: 1, 128>}, {transform_indices = @transform_1, window_bounds = array<i64: 1, 128>}, {pipeline_mode = #tpu.pipeline_mode<synchronous>, transform_indices = @transform_2, window_bounds = array<i64: 2, 16, 128>}, {transform_indices = @transform_3, window_bounds = array<i64: 1, 128>}, {transform_indices = @transform_4, window_bounds = array<i64: 1, 128>}, {transform_indices = @transform_5, window_bounds = array<i64: 1, 128>}]} {
    %0 = tpu.iota {dimensions = array<i32: 0>} : vector<16x128xi32>
    %c0 = arith.constant 0 : index
    %c0_0 = arith.constant 0 : index
    %1 = vector.load %arg1[%c0, %c0_0] : memref<1x128xi32, #tpu.memory_space<vmem>>, vector<1x128xi32>
    %2 = vector.broadcast %1 : vector<1x128xi32> to vector<16x128xi32>
    %3 = arith.cmpi eq, %0, %2 : vector<16x128xi32>
    %4 = arith.extui %3 : vector<16x128xi1> to vector<16x128xi32>
    %5 = arith.sitofp %4 : vector<16x128xi32> to vector<16x128xf32>
    %6 = arith.truncf %5 : vector<16x128xf32> to vector<16x128xbf16>
    %c0_1 = arith.constant 0 : index
    %c0_2 = arith.constant 0 : index
    %7 = vector.load %arg2[%c0_1, %c0_2] : memref<1x128xi32, #tpu.memory_space<vmem>>, vector<1x128xi32>
    %8 = vector.broadcast %7 : vector<1x128xi32> to vector<16x128xi32>
    %9 = arith.cmpi eq, %0, %8 : vector<16x128xi32>
    %10 = arith.extui %9 : vector<16x128xi1> to vector<16x128xi32>
    %11 = arith.sitofp %10 : vector<16x128xi32> to vector<16x128xf32>
    %12 = arith.truncf %11 : vector<16x128xf32> to vector<16x128xbf16>
    %c0_3 = arith.constant 0 : index
    %c0_4 = arith.constant 0 : index
    %c0_5 = arith.constant 0 : index
    %13 = vector.load %arg3[%c0_3, %c0_4, %c0_5] : memref<2x16x128xf32, #tpu.memory_space<vmem>>, vector<1x16x128xf32>
    %14 = vector.shape_cast %13 : vector<1x16x128xf32> to vector<16x128xf32>
    %15 = arith.truncf %14 : vector<16x128xf32> to vector<16x128xbf16>
    %c1 = arith.constant 1 : index
    %c0_6 = arith.constant 0 : index
    %c0_7 = arith.constant 0 : index
    %16 = vector.load %arg3[%c1, %c0_6, %c0_7] : memref<2x16x128xf32, #tpu.memory_space<vmem>>, vector<1x16x128xf32>
    %17 = vector.shape_cast %16 : vector<1x16x128xf32> to vector<16x128xf32>
    %18 = arith.truncf %17 : vector<16x128xf32> to vector<16x128xbf16>
    %cst = arith.constant dense<0.000000e+00> : vector<128x128xf32>
    %19 = tpu.matmul %15, %6, %cst {dimension_numbers = #tpu.dot_dimension_numbers<[0], [0], [1], [1], [0, 1, 1, 1], [], []>} : vector<16x128xbf16>, vector<16x128xbf16>, vector<128x128xf32> -> vector<128x128xf32>
    %cst_8 = arith.constant dense<0.000000e+00> : vector<128x128xf32>
    %20 = tpu.matmul %18, %12, %cst_8 {dimension_numbers = #tpu.dot_dimension_numbers<[0], [0], [1], [1], [0, 1, 1, 1], [], []>} : vector<16x128xbf16>, vector<16x128xbf16>, vector<128x128xf32> -> vector<128x128xf32>
    %21 = arith.mulf %19, %20 : vector<128x128xf32>
    %cst_9 = arith.constant dense<0.000000e+00> : vector<128xf32>
    %22 = vector.multi_reduction <add>, %21, %cst_9 [0] : vector<128x128xf32> to vector<128xf32>
    %23 = vector.shape_cast %22 : vector<128xf32> to vector<1x128xf32>
    %24 = arith.mulf %19, %19 : vector<128x128xf32>
    %cst_10 = arith.constant dense<0.000000e+00> : vector<128xf32>
    %25 = vector.multi_reduction <add>, %24, %cst_10 [0] : vector<128x128xf32> to vector<128xf32>
    %26 = vector.shape_cast %25 : vector<128xf32> to vector<1x128xf32>
    %27 = arith.mulf %20, %20 : vector<128x128xf32>
    %cst_11 = arith.constant dense<0.000000e+00> : vector<128xf32>
    %28 = vector.multi_reduction <add>, %27, %cst_11 [0] : vector<128x128xf32> to vector<128xf32>
    %29 = vector.shape_cast %28 : vector<128xf32> to vector<1x128xf32>
    %30 = arith.mulf %26, %29 : vector<1x128xf32>
    %31 = math.rsqrt %30 : vector<1x128xf32>
    %32 = arith.mulf %23, %31 : vector<1x128xf32>
    %c0_12 = arith.constant 0 : index
    %c0_13 = arith.constant 0 : index
    %33 = vector.load %arg4[%c0_12, %c0_13] : memref<1x128xf32, #tpu.memory_space<vmem>>, vector<1x128xf32>
    %cst_14 = arith.constant 0.899999976 : f32
    %34 = vector.broadcast %cst_14 : f32 to vector<1x128xf32>
    %35 = arith.mulf %34, %33 : vector<1x128xf32>
    %c0_15 = arith.constant 0 : index
    %c0_16 = arith.constant 0 : index
    %36 = vector.load %arg5[%c0_15, %c0_16] : memref<1x128xf32, #tpu.memory_space<vmem>>, vector<1x128xf32>
    %cst_17 = arith.constant 1.000000e-01 : f32
    %37 = vector.broadcast %cst_17 : f32 to vector<1x128xf32>
    %38 = arith.mulf %37, %36 : vector<1x128xf32>
    %39 = arith.addf %35, %38 : vector<1x128xf32>
    %cst_18 = arith.constant 2.000000e+00 : f32
    %40 = vector.broadcast %cst_18 : f32 to vector<1x128xf32>
    %41 = arith.mulf %40, %39 : vector<1x128xf32>
    %42 = arith.subf %41, %32 : vector<1x128xf32>
    %c0_19 = arith.constant 0 : index
    %c0_20 = arith.constant 0 : index
    %43 = vector.load %arg6[%c0_19, %c0_20] : memref<1x128xf32, #tpu.memory_space<vmem>>, vector<1x128xf32>
    tpu.vector_store %arg6[%c0_19, %c0_20], %42 {strides = array<i32>} : memref<1x128xf32, #tpu.memory_space<vmem>>, vector<1x128xf32>,
    return
  }
  func.func @transform_0(%arg0: i32) -> (i32, i32) {
    %c0_i32 = arith.constant 0 : i32
    %c0_i32_0 = arith.constant 0 : i32
    return %c0_i32, %arg0 : i32, i32
  }
  func.func @transform_1(%arg0: i32) -> (i32, i32) {
    %c0_i32 = arith.constant 0 : i32
    %c0_i32_0 = arith.constant 0 : i32
    return %c0_i32, %arg0 : i32, i32
  }
  func.func @transform_2(%arg0: i32) -> (i32, i32, i32) {
    %c0_i32 = arith.constant 0 : i32
    %c0_i32_0 = arith.constant 0 : i32
    %c0_i32_1 = arith.constant 0 : i32
    %c0_i32_2 = arith.constant 0 : i32
    return %c0_i32, %c0_i32_0, %c0_i32_1 : i32, i32, i32
  }
  func.func @transform_3(%arg0: i32) -> (i32, i32) {
    %c0_i32 = arith.constant 0 : i32
    %c0_i32_0 = arith.constant 0 : i32
    return %c0_i32, %arg0 : i32, i32
  }
  func.func @transform_4(%arg0: i32) -> (i32, i32) {
    %c0_i32 = arith.constant 0 : i32
    %c0_i32_0 = arith.constant 0 : i32
    return %c0_i32, %arg0 : i32, i32
  }
  func.func @transform_5(%arg0: i32) -> (i32, i32) {
    %c0_i32 = arith.constant 0 : i32
    %c0_i32_0 = arith.constant 0 : i32
    return %c0_i32, %arg0 : i32, i32
  }
}

</mosaic_0001>

<bundles_post_ra>
// kernel: mul.2
= control target key start
LH: loop header
LB: loop body
LE: loop exit
PB: predicated region body
PF: predicated region fallthrough
CT: control target
= control target key end

     0   :  { %s34_s0 = inlined_call_operand.vmem [shape: f32[32], index: 0, kind: input, shape index: {}]   ;;  %s35_s1 = inlined_call_operand.vmem [shape: f32[32], index: 1, kind: input, shape index: {}]   ;;  %s36_s2 = inlined_call_operand.vmem [shape: f32[32], index: 2, kind: output, shape index: {}]  }
   0x1   :  { %v3_v0 = vld [vmem:[%s34_s0] sm:$0x1] }
   0x2   :  { %v4_v1 = vld [vmem:[%s35_s1] sm:$0x1] }
   0x3   :  { %v7_v2 = vmul.f32 %v4_v1, %v3_v0 }
   0x5   :  { %9 = vst [vmem:[%s36_s2] sm:$0x1] %v7_v2 }

// kernel: gdes_forward.3
= control target key start
LH: loop header
LB: loop body
LE: loop exit
PB: predicated region body
PF: predicated region fallthrough
CT: control target
= control target key end

     0   :  { %vm22_vm0 = vcmask 64512   ;;  %s240_s3 = inlined_call_operand.vmem [shape: f32[8,128], index: 3, kind: input, shape index: {}]   ;;  %s241_s0 = inlined_call_operand.vmem [shape: f32[16,8], index: 0, kind: input, shape index: {}]   ;;  %s242_s1 = inlined_call_operand.vmem [shape: f32[1,8], index: 1, kind: input, shape index: {}]   ;;  %s243_s2 = inlined_call_operand.vmem [shape: f32[1,8], index: 2, kind: input, shape index: {}]   ;;  %s244_s4 = inlined_call_operand.vmem [shape: f32[1,128], index: 4, kind: input, shape index: {}]   ;;  %s245_s5 = inlined_call_operand.vmem [shape: f32[16,128], index: 5, kind: output, shape index: {}]  }
   0x1   :  { %v70_v0 = vld [vmem:[%s240_s3] sm:$0xff]  ;;  %v21_v2 = vld [vmem:[%s241_s0 + $0x8] sm:$0xff] }
   0x2   :  { %v20_v1 = vld [vmem:[%s241_s0] sm:$0xff]  ;;  %173 = vmatprep.subr.mxu0 %v70_v0  ;;  %v24_v4 = vsel %vm22_vm0, %v21_v2, 0.0 }
   0x3   :  { %v23_v3 = vsel %vm22_vm0, %v20_v1, 0.0  ;;  %174 = vmatpush3.msra.mxu0 %v70_v0  ;;  %v165_v29 = vld [vmem:[%s242_s1] ss:$0 sm:$0xff] }
   0x4   :  { %v25_v5 = vadd.f32 %v24_v4, %v23_v3  ;;  %v166_v32 = vld [vmem:[%s243_s2] ss:$0 sm:$0xff] }
   0x5   :  { %v167_v37 = vld [vmem:[%s244_s4] ss:$0 sm:$0xff] }
   0x6   :  { %v26_v6 = vrot.slane %v25_v5, 4 }
   0x8   :  { %v27_v7 = vadd.f32 %v26_v6, %v25_v5 }
   0xa   :  { %v28_v8 = vrot.slane %v27_v7, 2 }
   0xc   :  { %v29_v9 = vadd.f32 %v28_v8, %v27_v7 }
   0xe   :  { %v30_v10 = vrot.slane %v29_v9, 1 }
  0x10   :  { %v31_v11 = vadd.f32 %v30_v10, %v29_v9 }
  0x12   :  { %v33_v12 = vmul.f32 0.0625, %v31_v11 }
  0x14   :  { %v34_v13 = vsub.f32 %v20_v1, %v33_v12  ;;  %v35_v14 = vsub.f32 %v21_v2, %v33_v12 }
  0x16   :  { %v36_v15 = vmul.f32 %v34_v13, %v34_v13  ;;  %v37_v16 = vmul.f32 %v35_v14, %v35_v14 }
  0x18   :  { %v38_v17 = vsel %vm22_vm0, %v36_v15, 0.0  ;;  %v39_v18 = vsel %vm22_vm0, %v37_v16, 0.0 }
  0x19   :  { %v40_v19 = vadd.f32 %v39_v18, %v38_v17 }
  0x1b   :  { %v41_v20 = vrot.slane %v40_v19, 4 }
  0x1d   :  { %v42_v21 = vadd.f32 %v41_v20, %v40_v19 }
  0x1f   :  { %v43_v22 = vrot.slane %v42_v21, 2 }
  0x21   :  { %v44_v23 = vadd.f32 %v43_v22, %v42_v21 }
  0x23   :  { %v45_v24 = vrot.slane %v44_v23, 1 }
  0x25   :  { %v46_v25 = vadd.f32 %v45_v24, %v44_v23 }
  0x27   :  { %v47_v26 = vmul.f32 0.0625, %v46_v25 }
  0x29   :  { %v48_v27 = vadd.f32 1e-05, %v47_v26 }
  0x2b   :  { %178 = vrsqrt.f32 %v48_v27 }
  0x35   :  { %v179_v28 = vpop.eup %178 }
  0x36   :  { %v50_v30 = vmul.f32 %v179_v28, %v34_v13  ;;  %v51_v31 = vmul.f32 %v179_v28, %v35_v14 }
  0x38   :  { %v59_v33 = vmul.f32 %v165_v29, %v50_v30  ;;  %v60_v34 = vmul.f32 %v165_v29, %v51_v31 }
  0x3a   :  { %v68_v35 = vadd.f32 %v166_v32, %v59_v33  ;;  %v69_v36 = vadd.f32 %v166_v32, %v60_v34 }
  0x3c   :  { %175 = vmatprep.mubr.msk.f32.mxu0 %vm22_vm0, %v68_v35 }
  0x3d   :  { %176 = vmatmul.mubr.msk.f32.vlgmr.msra.gmra.mrb[0].mxu0 %vm22_vm0, %v69_v36 }
 0x110   :  { %v177_v38 = vpop.f32.mrb[0].mxu0 }
 0x111   :  { %v156_v39 = vadd.f32 %v177_v38, %v167_v37  ;;  %v150_v40 = vpop.f32.mrb[1].mxu0 }
 0x112   :  { %v151_v41 = vadd.f32 %v167_v37, %v150_v40 }
 0x113   :  { %160 = vst [vmem:[%s245_s5 + $0x8] sm:$0xff] %v156_v39 }
 0x114   :  { %159 = vst [vmem:[%s245_s5] sm:$0xff] %v151_v41 }

// kernel: gdes_forward.4
= control target key start
LH: loop header
LB: loop body
LE: loop exit
PB: predicated region body
PF: predicated region fallthrough
CT: control target
= control target key end

     0   :  { %s642_s18 = smov 0   ;;  %s704_s0 = inlined_call_operand.vmem [shape: bf16[2,16,16], index: 0, kind: input, shape index: {}]   ;;  %s705_s1 = inlined_call_operand.vmem [shape: f32[16,128], index: 1, kind: input, shape index: {}]   ;;  %s706_s2 = inlined_call_operand.vmem [shape: f32[1,128], index: 2, kind: input, shape index: {}]   ;;  %s707_s3 = inlined_call_operand.vmem [shape: bf16[128,128], index: 3, kind: input, shape index: {}]   ;;  %s708_s4 = inlined_call_operand.vmem [shape: f32[1,128], index: 4, kind: input, shape index: {}]   ;;  %s709_s5 = inlined_call_operand.vmem [shape: f32[2,16,128], index: 5, kind: output, shape index: {}]  }
   0x1 LB: > { %s512_s19 = sadd.s32 4294967295, %s608_s18   ;;  %p516_p0 = scmp.ge.s32.totalorder %s608_s18, 1  ;;  %s608_s18 = sphi %s642_s18, %s15_s18  }
   0x2   : > { %p187_p1 = scmp.lt.s32.totalorder %s608_s18, 3 }
   0x4   : > { %p188_p2 = pnand %p516_p0, %p187_p1 }
   0x5   : > { %v228_v0 = vld [vmem:[%s705_s1] sm:$0xff] (!%p188_p2)  ;;  %v229_v1 = vld [vmem:[%s705_s1 + $0x8] sm:$0xff] (!%p188_p2)  ;;  %p215_p3 = scmp.lt.s32.totalorder (!%p188_p2), %s512_s19, 1  ;;  %v610_v2 = vmov (!%p188_p2), 0.0   ;;  %vm611_vm0 = vmmov (!%p188_p2), 0   ;;  %vm243_vm1 = vcmask (!%p188_p2), 130048  }
   0x6   : > { %191 = sbr.rel (%p188_p2) target bundleno = 677 (0x2a5), region = 40  ;;  %551 = vmatprep.subr.bf16.mxu0 (!%p188_p2), %v610_v2  ;;  %v230_v3 = vpack.c.bf16 (!%p188_p2), %v229_v1, %v228_v0  ;;  %553 = vmatprep.mubr.msk.bf16.mxu0 (!%p188_p2), %vm611_vm0, %v610_v2  ;;  %v594_v4 = vld [vmem:[%s707_s3] sm:$0xff] (!%p188_p2)   ;;  %v595_v5 = vld [vmem:[%s707_s3 + $0x8] sm:$0xff] (!%p188_p2)   ;;  %v596_v7 = vld [vmem:[%s707_s3 + $0x10] sm:$0xff] (!%p188_p2)  }
   0x7   : > { %557 = vmatprep.subr.bf16.mxu1 (!%p188_p2), %v610_v2  ;;  %573 = vmatprep.mubr.msk.bf16.mxu1 (!%p188_p2), %vm611_vm0, %v610_v2  ;;  %v597_v8 = vld [vmem:[%s707_s3 + $0x18] sm:$0xff] (!%p188_p2)   ;;  %v598_v9 = vld [vmem:[%s707_s3 + $0x20] sm:$0xff] (!%p188_p2)   ;;  %v599_v10 = vld [vmem:[%s707_s3 + $0x28] sm:$0xff] (!%p188_p2)  }
   0x8   : > { %552 = vmatpush3.bf16.msra.mxu0 (!%p188_p2), %v230_v3  ;;  %558 = vmatpush3.bf16.msra.mxu1 (!%p188_p2), %v594_v4  ;;  %v600_v11 = vld [vmem:[%s707_s3 + $0x30] sm:$0xff] (!%p188_p2)   ;;  %v601_v12 = vld [vmem:[%s707_s3 + $0x38] sm:$0xff] (!%p188_p2)   ;;  %v521_v13 = vld [vmem:[%s706_s2] ss:$0 sm:$0xff] (!%p188_p2) }
   0x9   : > { %559 = vmatprep.subr.bf16.mxu1 (!%p188_p2), %v610_v2  ;;  %577 = vmatprep.subr.bf16.mxu0 (!%p188_p2), %v610_v2  ;;  %v532_v30 = vld [vmem:[%s708_s4] ss:$0 sm:$0xff] (!%p188_p2) }
   0xc   : > { %560 = vmatpush3.bf16.msra.mxu1 (!%p188_p2), %v595_v5 }
   0xd   : > { %s711_s19 = smov (!%p215_p3, %s512_s19), 1  ;;  %561 = vmatprep.subr.bf16.mxu1 %v610_v2 }
   0xe   : > { %s536_s28 = sshll.u32 %s711_s19, 3  ;;  %s537_s25 = sshll.u32 %s711_s19, 4 }
   0xf   : > { %s219_s6 = scalar_lea.vmem %s704_s0, %s536_s28  ;;  %s224_s28 = scalar_lea.vmem %s709_s5, %s537_s25 }
  0x10   : > { %v593_v6 = vld [vmem:[%s219_s6] sm:$0xff]   ;;  %562 = vmatpush3.bf16.msra.mxu1 %v596_v7 }
  0x11   : > { %554 = vmatmul.mubr.msk.bf16.vlgmr.msra.gmra.mrb[0].mxu0 %vm243_vm1, %v593_v6  ;;  %563 = vmatprep.subr.bf16.mxu1 %v610_v2 }
  0x12   : > { %579 = vmatprep.mubr.msk.bf16.mxu0 %vm611_vm0, %v610_v2 }
  0x14   : > { %564 = vmatpush3.bf16.msra.mxu1 %v597_v8 }
  0x15   : > { %565 = vmatprep.subr.bf16.mxu1 %v610_v2 }
  0x18   : > { %566 = vmatpush3.bf16.msra.mxu1 %v598_v9 }
  0x19   : > { %567 = vmatprep.subr.bf16.mxu1 %v610_v2 }
  0x1c   : > { %568 = vmatpush3.bf16.msra.mxu1 %v599_v10 }
  0x1d   : > { %569 = vmatprep.subr.bf16.mxu1 %v610_v2 }
  0x20   : > { %570 = vmatpush3.bf16.msra.mxu1 %v600_v11 }
  0x21   : > { %571 = vmatprep.subr.bf16.mxu1 %v610_v2 }
  0x24   : > { %572 = vmatpush3.bf16.msra.mxu1 %v601_v12 }
  0xe4   : > { %v281_v14 = vpop.f32.mrb[0].mxu0 }
  0xe5   : > { %v282_v15 = vadd.f32 %v521_v13, %v281_v14  ;;  %v555_v16 = vpop.f32.mrb[1].mxu0 }
  0xe6   : > { %v284_v17 = vpop.f32.mrb[2].mxu0 }
  0xe7   : > { %v290_v18 = vmul.f32 0.01, %v282_v15  ;;  %v285_v19 = vadd.f32 %v521_v13, %v284_v17  ;;  %v556_v20 = vpop.f32.mrb[3].mxu0  ;;  %vm288_vm2 = vcmp.gt.f32.partialorder %v282_v15, 0.0 }
  0xe9   : > { %vm289_vm3 = vcmp.gt.f32.partialorder %v285_v19, 0.0  ;;  %v291_v21 = vmul.f32 0.01, %v285_v19  ;;  %v292_v22 = vsel %vm288_vm2, %v282_v15, %v290_v18 }
  0xeb   : > { %v293_v23 = vsel %vm289_vm3, %v285_v19, %v291_v21 }
  0xec   : > { %v294_v24 = vpack.c.bf16 %v293_v23, %v292_v22 }
  0xee   : > { %574 = vmatmul.mubr.bf16.vlgmr.msra.gmra.mrb[0].mxu1 %v294_v24 }
 0x1c1   : > { %v393_v25 = vpop.f32.mrb[0].mxu1 }
 0x1c2   : > { %v575_v26 = vpop.f32.mrb[1].mxu1 }
 0x1c3   : > { %v396_v27 = vpop.f32.mrb[2].mxu1 }
 0x1c4   : > { %v400_v28 = vpack.c.bf16 %v396_v27, %v393_v25  ;;  %v576_v29 = vpop.f32.mrb[3].mxu1 }
 0x1c6   : > { %578 = vmatpush3.bf16.msra.mxu0 %v400_v28 }
 0x1c9   : > { %580 = vmatmul.mubr.msk.bf16.vlgmr.msra.gmra.mrb[4].mxu0 %vm243_vm1, %v593_v6 }
 0x29c   : > { %v442_v31 = vpop.f32.mrb[4].mxu0 }
 0x29d   : > { %v443_v32 = vadd.f32 %v532_v30, %v442_v31  ;;  %v581_v33 = vpop.f32.mrb[5].mxu0 }
 0x29e   : > { %v445_v34 = vpop.f32.mrb[6].mxu0 }
 0x29f   : > { %vm449_vm4 = vcmp.gt.f32.partialorder %v443_v32, 0.0  ;;  %v451_v35 = vmul.f32 0.01, %v443_v32  ;;  %v446_v36 = vadd.f32 %v532_v30, %v445_v34  ;;  %v582_v37 = vpop.f32.mrb[7].mxu0 }
 0x2a1   : > { %v453_v38 = vsel %vm449_vm4, %v443_v32, %v451_v35  ;;  %vm450_vm5 = vcmp.gt.f32.partialorder %v446_v36, 0.0  ;;  %v452_v39 = vmul.f32 0.01, %v446_v36 }
 0x2a2   : > { %455 = vst [vmem:[%s224_s28] sm:$0xff] %v453_v38 }
 0x2a3   : > { %v454_v40 = vsel %vm450_vm5, %v446_v36, %v452_v39 }
 0x2a4   : > { %456 = vst [vmem:[%s224_s28 + $0x8] sm:$0xff] %v454_v40 }
 0x2a5 PF: > { %s15_s18 = sadd.s32 1, %s608_s18  }
 0x2a6   : > { %p12_p4 = scmp.ge.s32.totalorder %s15_s18, 4  }
 0x2a8   :  { %14 = sbr.rel (!%p12_p4) target bundleno = 1 (0x1), region = 70 }

// kernel: gdes_forward.5
= control target key start
LH: loop header
LB: loop body
LE: loop exit
PB: predicated region body
PF: predicated region fallthrough
CT: control target
= control target key end

     0   :  { %v21_v0 = vlaneseq  ;;  %v542_v7 = vmov 1.0|1.0   ;;  %vm71_vm6 = vcmask 130048   ;;  %s655_s2 = inlined_call_operand.vmem [shape: f32[2,16,128], index: 2, kind: input, shape index: {}]   ;;  %s656_s0 = inlined_call_operand.vmem [shape: s32[1,128], index: 0, kind: input, shape index: {}]   ;;  %s657_s1 = inlined_call_operand.vmem [shape: s32[1,128], index: 1, kind: input, shape index: {}]   ;;  %s658_s3 = inlined_call_operand.vmem [shape: f32[1,128], index: 3, kind: input, shape index: {}]   ;;  %s659_s4 = inlined_call_operand.vmem [shape: f32[1,128], index: 4, kind: input, shape index: {}]   ;;  %s660_s5 = inlined_call_operand.vmem [shape: f32[1,128], index: 5, kind: output, shape index: {}]  }
   0x1   :  { %v48_v1 = vld [vmem:[%s655_s2] sm:$0xff]  ;;  %v49_v2 = vld [vmem:[%s655_s2 + $0x8] sm:$0xff]  ;;  %v462_v9 = vld [vmem:[%s655_s2 + $0x10] sm:$0xff] }
   0x2   :  { %v50_v3 = vpack.c.bf16 %v49_v2, %v48_v1  ;;  %v22_v4 = vshrl.u32 %v21_v0, 7  ;;  %v456_v5 = vld [vmem:[%s656_s0] ss:$0 sm:$0xff]  ;;  %v463_v10 = vld [vmem:[%s655_s2 + $0x18] sm:$0xff] }
   0x3   :  { %v459_v8 = vld [vmem:[%s657_s1] ss:$0 sm:$0xff]  ;;  %v54_v11 = vpack.c.bf16 %v463_v10, %v462_v9 }
   0x4   :  { %55 = vxpose.xlu0.c.b16.start.end [1/1] (short) %v50_v3, 128  ;;  %v23_v6 = vadd.s32 8, %v22_v4  ;;  %vm29_vm0 = vcmp.eq.s32.totalorder %v22_v4, %v456_v5  ;;  %vm41_vm3 = vcmp.eq.s32.totalorder %v22_v4, %v459_v8 }
   0x6   :  { %vm30_vm1 = vcmp.eq.s32.totalorder %v23_v6, %v456_v5  ;;  %vm42_vm4 = vcmp.eq.s32.totalorder %v23_v6, %v459_v8 }
   0x7   :  { %vm464_vm2 = vmpackc.low %vm30_vm1, %vm29_vm0 }
   0x8   :  { %502 = vmatprep.subr.msk.bf16.mxu0 %vm464_vm2, %v542_v7  ;;  %vm474_vm5 = vmpackc.low %vm42_vm4, %vm41_vm3 }
   0x9   :  { %503 = vmatpush3.bf16.msk.msra.mxu0 %vm464_vm2, %v542_v7  ;;  %520 = vmatprep.subr.msk.bf16.mxu1 %vm474_vm5, %v542_v7 }
   0xa   :  { %521 = vmatpush3.bf16.msk.msra.mxu1 %vm474_vm5, %v542_v7 }
  0x21   :  { %193 = vxpose.xlu0.c.b16.start.end [1/1] (short) %v54_v11, 128 }
  0x6a   :  { %v63_v12 = vpop.trf.xlu0 }
  0x6b   :  { %504 = vmatprep.mubr.msk.bf16.mxu0 %vm71_vm6, %v63_v12 }
  0x6e   :  { %v64_v13 = vpop.trf.xlu0 }
  0x6f   :  { %505 = vmatmul.mubr.msk.bf16.vlgmr.msra.gmra.mrb[0].mxu0 %vm71_vm6, %v64_v13 }
  0x72   :  { %v65_v14 = vpop.trf.xlu0 }
  0x73   :  { %508 = vmatprep.mubr.msk.bf16.mxu0 %vm71_vm6, %v65_v14 }
  0x76   :  { %v66_v15 = vpop.trf.xlu0 }
  0x77   :  { %509 = vmatmul.mubr.msk.bf16.gmra.mrb[4].mxu0 %vm71_vm6, %v66_v15 }
  0x7a   :  { %v67_v16 = vpop.trf.xlu0 }
  0x7b   :  { %512 = vmatprep.mubr.msk.bf16.mxu0 %vm71_vm6, %v67_v16 }
  0x7e   :  { %v68_v17 = vpop.trf.xlu0 }
  0x7f   :  { %513 = vmatmul.mubr.msk.bf16.gmra.mrb[8].mxu0 %vm71_vm6, %v68_v17 }
  0x82   :  { %v69_v18 = vpop.trf.xlu0 }
  0x83   :  { %516 = vmatprep.mubr.msk.bf16.mxu0 %vm71_vm6, %v69_v18 }
  0x86   :  { %v70_v19 = vpop.trf.xlu0 }
  0x87   :  { %517 = vmatmul.mubr.msk.bf16.gmra.mrb[12].mxu0 %vm71_vm6, %v70_v19 }
  0x8a   :  { %v201_v20 = vpop.trf.xlu0 }
  0x8b   :  { %522 = vmatprep.mubr.msk.bf16.mxu1 %vm71_vm6, %v201_v20 }
  0x8e   :  { %v202_v21 = vpop.trf.xlu0 }
  0x8f   :  { %523 = vmatmul.mubr.msk.bf16.vlgmr.msra.gmra.mrb[0].mxu1 %vm71_vm6, %v202_v21 }
  0x92   :  { %v203_v22 = vpop.trf.xlu0 }
  0x93   :  { %526 = vmatprep.mubr.msk.bf16.mxu1 %vm71_vm6, %v203_v22 }
  0x96   :  { %v204_v23 = vpop.trf.xlu0 }
  0x97   :  { %527 = vmatmul.mubr.msk.bf16.gmra.mrb[4].mxu1 %vm71_vm6, %v204_v23 }
  0x9a   :  { %v205_v24 = vpop.trf.xlu0 }
  0x9b   :  { %530 = vmatprep.mubr.msk.bf16.mxu1 %vm71_vm6, %v205_v24 }
  0x9e   :  { %v206_v25 = vpop.trf.xlu0 }
  0x9f   :  { %531 = vmatmul.mubr.msk.bf16.gmra.mrb[8].mxu1 %vm71_vm6, %v206_v25 }
  0xa2   :  { %v207_v26 = vpop.trf.xlu0 }
  0xa3   :  { %534 = vmatprep.mubr.msk.bf16.mxu1 %vm71_vm6, %v207_v26 }
  0xa6   :  { %v208_v27 = vpop.trf.xlu0 }
  0xa7   :  { %535 = vmatmul.mubr.msk.bf16.gmra.mrb[12].mxu1 %vm71_vm6, %v208_v27 }
 0x142   :  { %v506_v28 = vpop.f32.mrb[0].mxu0 }
 0x143   :  { %v130_v29 = vpop.f32.mrb[1].mxu0  ;;  %v369_v34 = vmul.f32 %v506_v28, %v506_v28 }
 0x144   :  { %v507_v30 = vpop.f32.mrb[2].mxu0  ;;  %v367_v32 = vmul.f32 %v130_v29, %v130_v29 }
 0x145   :  { %v133_v31 = vpop.f32.mrb[3].mxu0  ;;  %v370_v36 = vmul.f32 %v507_v30, %v507_v30 }
 0x146   :  { %v368_v33 = vmul.f32 %v133_v31, %v133_v31 }
 0x148   :  { %v383_v35 = vadd.f32 %v368_v33, %v367_v32 }
 0x14a   :  { %v384_v37 = vadd.f32 %v383_v35, %v369_v34  ;;  %v510_v38 = vpop.f32.mrb[4].mxu0 }
 0x14b   :  { %v146_v39 = vpop.f32.mrb[5].mxu0  ;;  %v373_v46 = vmul.f32 %v510_v38, %v510_v38 }
 0x14c   :  { %v371_v40 = vmul.f32 %v146_v39, %v146_v39  ;;  %v385_v41 = vadd.f32 %v384_v37, %v370_v36  ;;  %v511_v42 = vpop.f32.mrb[6].mxu0 }
 0x14d   :  { %v149_v43 = vpop.f32.mrb[7].mxu0  ;;  %v374_v48 = vmul.f32 %v511_v42, %v511_v42 }
 0x14e   :  { %v386_v44 = vadd.f32 %v385_v41, %v371_v40  ;;  %v372_v45 = vmul.f32 %v149_v43, %v149_v43 }
 0x150   :  { %v387_v47 = vadd.f32 %v386_v44, %v372_v45 }
 0x152   :  { %v388_v49 = vadd.f32 %v387_v47, %v373_v46  ;;  %v514_v50 = vpop.f32.mrb[8].mxu0 }
 0x153   :  { %v607_v51 = vpop.f32.mrb[9].mxu0  ;;  %v377_v58 = vmul.f32 %v514_v50, %v514_v50 }
 0x154   :  { %v375_v52 = vmul.f32 %v607_v51, %v607_v51  ;;  %v389_v53 = vadd.f32 %v388_v49, %v374_v48  ;;  %v611_v54 = vpop.f32.mrb[10].mxu0 }
 0x155   :  { %v613_v55 = vpop.f32.mrb[11].mxu0  ;;  %v378_v60 = vmul.f32 %v611_v54, %v611_v54 }
 0x156   :  { %v390_v56 = vadd.f32 %v389_v53, %v375_v52  ;;  %v376_v57 = vmul.f32 %v613_v55, %v613_v55 }
 0x158   :  { %v391_v59 = vadd.f32 %v390_v56, %v376_v57 }
 0x15a   :  { %v392_v61 = vadd.f32 %v391_v59, %v377_v58  ;;  %v619_v62 = vpop.f32.mrb[12].mxu0 }
 0x15b   :  { %v621_v63 = vpop.f32.mrb[13].mxu0  ;;  %v381_v6 = vmul.f32 %v619_v62, %v619_v62 }
 0x15c   :  { %v379_v0 = vmul.f32 %v621_v63, %v621_v63  ;;  %v393_v1 = vadd.f32 %v392_v61, %v378_v60  ;;  %v625_v2 = vpop.f32.mrb[14].mxu0 }
 0x15d   :  { %v627_v3 = vpop.f32.mrb[15].mxu0  ;;  %v382_v8 = vmul.f32 %v625_v2, %v625_v2 }
 0x15e   :  { %v394_v4 = vadd.f32 %v393_v1, %v379_v0  ;;  %v380_v5 = vmul.f32 %v627_v3, %v627_v3 }
 0x160   :  { %v395_v7 = vadd.f32 %v394_v4, %v380_v5 }
 0x162   :  { %v396_v9 = vadd.f32 %v395_v7, %v381_v6  ;;  %v524_v10 = vpop.f32.mrb[0].mxu1 }
 0x163   :  { %v332_v11 = vmul.f32 %v524_v10, %v506_v28  ;;  %v267_v12 = vpop.f32.mrb[1].mxu1  ;;  %v406_v21 = vmul.f32 %v524_v10, %v524_v10 }
 0x164   :  { %v635_v13 = vadd.f32 %v396_v9, %v382_v8  ;;  %v330_v14 = vmul.f32 %v267_v12, %v130_v29  ;;  %v525_v15 = vpop.f32.mrb[2].mxu1  ;;  %v404_v18 = vmul.f32 %v267_v12, %v267_v12 }
 0x165   :  { %v333_v16 = vmul.f32 %v525_v15, %v507_v30  ;;  %v270_v17 = vpop.f32.mrb[3].mxu1  ;;  %v407_v27 = vmul.f32 %v525_v15, %v525_v15 }
 0x166   :  { %v331_v19 = vmul.f32 %v270_v17, %v133_v31  ;;  %v405_v20 = vmul.f32 %v270_v17, %v270_v17 }
 0x168   :  { %v346_v22 = vadd.f32 %v331_v19, %v330_v14  ;;  %v420_v23 = vadd.f32 %v405_v20, %v404_v18 }
 0x16a   :  { %v347_v24 = vadd.f32 %v346_v22, %v332_v11  ;;  %v421_v25 = vadd.f32 %v420_v23, %v406_v21  ;;  %v528_v26 = vpop.f32.mrb[4].mxu1 }
 0x16b   :  { %v336_v32 = vmul.f32 %v528_v26, %v510_v38  ;;  %v283_v33 = vpop.f32.mrb[5].mxu1  ;;  %v410_v46 = vmul.f32 %v528_v26, %v528_v26 }
 0x16c   :  { %v334_v28 = vmul.f32 %v283_v33, %v146_v39  ;;  %v348_v34 = vadd.f32 %v347_v24, %v333_v16  ;;  %v408_v35 = vmul.f32 %v283_v33, %v283_v33  ;;  %v529_v36 = vpop.f32.mrb[6].mxu1  ;;  %v422_v29 = vadd.f32 %v421_v25, %v407_v27 }
 0x16d   :  { %v337_v37 = vmul.f32 %v529_v36, %v511_v42  ;;  %v286_v30 = vpop.f32.mrb[7].mxu1  ;;  %v411_v52 = vmul.f32 %v529_v36, %v529_v36  ;;  %v398_v16 = vrot.slane %v635_v13, 4 }
 0x16e   :  { %v349_v40 = vadd.f32 %v348_v34, %v334_v28  ;;  %v335_v41 = vmul.f32 %v286_v30, %v149_v43  ;;  %v409_v31 = vmul.f32 %v286_v30, %v286_v30  ;;  %v423_v44 = vadd.f32 %v422_v29, %v408_v35 }
 0x170   :  { %v350_v45 = vadd.f32 %v349_v40, %v335_v41  ;;  %v424_v47 = vadd.f32 %v423_v44, %v409_v31 }
 0x172   :  { %v351_v48 = vadd.f32 %v350_v45, %v336_v32  ;;  %v532_v49 = vpop.f32.mrb[8].mxu1  ;;  %v425_v53 = vadd.f32 %v424_v47, %v410_v46  ;;  %v444_v45 = vld [vmem:[%s658_s3] sm:$0x1] }
 0x173   :  { %v340_v38 = vmul.f32 %v532_v49, %v514_v50  ;;  %v299_v56 = vpop.f32.mrb[9].mxu1  ;;  %v414_v6 = vmul.f32 %v532_v49, %v532_v49  ;;  %v446_v46 = vld [vmem:[%s659_s4] sm:$0x1] }
 0x174   :  { %v338_v39 = vmul.f32 %v299_v56, %v607_v51  ;;  %v352_v57 = vadd.f32 %v351_v48, %v337_v37  ;;  %v412_v58 = vmul.f32 %v299_v56, %v299_v56  ;;  %v533_v59 = vpop.f32.mrb[10].mxu1  ;;  %v426_v42 = vadd.f32 %v425_v53, %v411_v52 }
 0x175   :  { %v341_v60 = vmul.f32 %v533_v59, %v611_v54  ;;  %v302_v43 = vpop.f32.mrb[11].mxu1  ;;  %v415_v9 = vmul.f32 %v533_v59, %v533_v59  ;;  %v445_v48 = vmul.f32 0.9, %v444_v45  ;;  %v447_v49 = vmul.f32 0.1, %v446_v46 }
 0x176   :  { %v353_v61 = vadd.f32 %v352_v57, %v338_v39  ;;  %v339_v0 = vmul.f32 %v302_v43, %v613_v55  ;;  %v413_v1 = vmul.f32 %v302_v43, %v302_v43  ;;  %v427_v4 = vadd.f32 %v426_v42, %v412_v58 }
 0x177   :  { %v448_v53 = vadd.f32 %v447_v49, %v445_v48 }
 0x178   :  { %v354_v5 = vadd.f32 %v353_v61, %v339_v0  ;;  %v428_v7 = vadd.f32 %v427_v4, %v413_v1 }
 0x179   :  { %v449_v56 = vmul.f32 2.0, %v448_v53 }
 0x17a   :  { %v355_v8 = vadd.f32 %v354_v5, %v340_v38  ;;  %v536_v50 = vpop.f32.mrb[12].mxu1  ;;  %v429_v10 = vadd.f32 %v428_v7, %v414_v6 }
 0x17b   :  { %v344_v51 = vmul.f32 %v536_v50, %v619_v62  ;;  %v315_v11 = vpop.f32.mrb[13].mxu1  ;;  %v399_v62 = vadd.f32 %v398_v16, %v635_v13  ;;  %v418_v24 = vmul.f32 %v536_v50, %v536_v50 }
 0x17c   :  { %v342_v12 = vmul.f32 %v315_v11, %v621_v63  ;;  %v356_v14 = vadd.f32 %v355_v8, %v341_v60  ;;  %v416_v54 = vmul.f32 %v315_v11, %v315_v11  ;;  %v537_v15 = vpop.f32.mrb[14].mxu1  ;;  %v430_v55 = vadd.f32 %v429_v10, %v415_v9 }
 0x17d   :  { %v345_v17 = vmul.f32 %v537_v15, %v625_v2  ;;  %v318_v18 = vpop.f32.mrb[15].mxu1  ;;  %v419_v26 = vmul.f32 %v537_v15, %v537_v15  ;;  %v400_v33 = vrot.slane %v399_v62, 2 }
 0x17e   :  { %v357_v19 = vadd.f32 %v356_v14, %v342_v12  ;;  %v343_v20 = vmul.f32 %v318_v18, %v627_v3  ;;  %v417_v21 = vmul.f32 %v318_v18, %v318_v18  ;;  %v431_v22 = vadd.f32 %v430_v55, %v416_v54 }
 0x17f   :  { %v401_v35 = vadd.f32 %v400_v33, %v399_v62 }
 0x180   :  { %v358_v23 = vadd.f32 %v357_v19, %v343_v20  ;;  %v432_v25 = vadd.f32 %v431_v22, %v417_v21 }
 0x181   :  { %v402_v37 = vrot.slane %v401_v35, 1 }
 0x182   :  { %v359_v63 = vadd.f32 %v358_v23, %v344_v51  ;;  %v433_v27 = vadd.f32 %v432_v25, %v418_v24 }
 0x183   :  { %v403_v41 = vadd.f32 %v402_v37, %v401_v35 }
 0x184   :  { %v360_v32 = vadd.f32 %v359_v63, %v345_v17  ;;  %v434_v28 = vadd.f32 %v433_v27, %v419_v26 }
 0x186   :  { %v435_v34 = vrot.slane %v434_v28, 4  ;;  %v361_v36 = vrot.slane %v360_v32, 4 }
 0x188   :  { %v436_v2 = vadd.f32 %v435_v34, %v434_v28  ;;  %v362_v30 = vadd.f32 %v361_v36, %v360_v32 }
 0x18a   :  { %v437_v29 = vrot.slane %v436_v2, 2  ;;  %v363_v13 = vrot.slane %v362_v30, 2 }
 0x18c   :  { %v438_v3 = vadd.f32 %v437_v29, %v436_v2  ;;  %v364_v47 = vadd.f32 %v363_v13, %v362_v30 }
 0x18e   :  { %v439_v40 = vrot.slane %v438_v3, 1  ;;  %v365_v52 = vrot.slane %v364_v47, 1 }
 0x190   :  { %v440_v31 = vadd.f32 %v439_v40, %v438_v3  ;;  %v366_v38 = vadd.f32 %v365_v52, %v364_v47 }
 0x192   :  { %v441_v44 = vmul.f32 %v440_v31, %v403_v41 }
 0x194   :  { %540 = vrsqrt.f32 %v441_v44 }
 0x19e   :  { %v541_v39 = vpop.eup %540 }
 0x19f   :  { %v443_v57 = vmul.f32 %v541_v39, %v366_v38 }
 0x1a1   :  { %v450_v58 = vsub.f32 %v449_v56, %v443_v57 }
 0x1a3   :  { %451 = vst [vmem:[%s660_s5] sm:$0x1] %v450_v58 }

</bundles_post_ra>
